<compile_context>
chip_gen: v5e
topology: v5e:2x2
jax: 0.10.0
libtpu: 0.0.40
codegen_flags: <defaults>
</compile_context>

<pallas_src>
import jax
import jax.numpy as jnp
from jax.experimental import pallas as pl
from jax.experimental.pallas import tpu as pltpu

EPS = 1e-8


def _cln_kernel(gamma_ref, beta_ref, y_ref, o_ref):
    # gamma_ref/beta_ref: (1, N, TK) f32 VMEM (resident); y_ref/o_ref: (TM, N, TK).
    y = y_ref[...].astype(jnp.float32)
    mean = jnp.mean(y, axis=1, keepdims=True)                    # (TM, 1, TK)
    centered = y - mean
    var = jnp.mean(centered * centered, axis=1, keepdims=True)   # unbiased=False
    inv_std = jax.lax.rsqrt(var + EPS)                           # EUP slot
    o_ref[...] = (gamma_ref[...] * centered * inv_std + beta_ref[...]).astype(o_ref.dtype)


def _vmem_capacity_bytes() -> int:
    """Per-core VMEM capacity; falls back to the v7x-safe 64 MiB."""
    try:
        info = pltpu.get_tpu_info()
        cap = getattr(info, "vmem_capacity_bytes", None)
        if cap:
            return int(cap)
    except Exception:
        pass
    return 64 << 20


def _select_tiles(M, N, K, in_itemsize, out_itemsize, vmem_cap):
    """Pick (TM, TK, vmem_limit_bytes) from an explicit VMEM budget."""
    vmem_limit = int((vmem_cap * 3) // 4)          # leave 25% for the compiler
    budget = vmem_limit - (2 << 20)                # misc / internal scratch headroom

    # Per-element VMEM footprint of a (TM, N, TK) block:
    #   double-buffered input + double-buffered output + ~3 f32 temporaries
    #   (upcast y, centered, pre-cast result) materialized inside the kernel.
    per_elem = 2 * in_itemsize + 2 * out_itemsize + 12
    # gamma + beta: f32, lane-dense (1, N, TK), conservatively x2 buffers each.
    param_per_nk = 2 * 2 * 4

    # Raw y-block target keeps per-step DMA chunky without starving VMEM:
    # ~4 MiB on 64 MiB parts (v7x), ~8 MiB on 128 MiB parts (v5e/v6e).
    raw_target = (4 << 20) if vmem_cap <= (64 << 20) else (8 << 20)

    def total_bytes(tm, tk):
        return tm * N * tk * per_elem + N * tk * param_per_nk

    # --- TK: prefer the full, contiguous last dim when one (1, N, K) slab fits.
    if total_bytes(1, K) <= budget and N * K * in_itemsize <= raw_target:
        tk = K
    elif K <= 128:
        tk = K                                      # tiny K; nothing to split
    else:
        cap_budget = budget // max(1, N * (per_elem + param_per_nk))
        cap_raw = raw_target // max(1, N * in_itemsize)
        tk = min(cap_budget, cap_raw, K)
        tk = max(128, (tk // 128) * 128)            # 128-multiple, masked K tail OK

    # --- TM: as many batch rows as fit next to the resident params.
    row_bytes = N * tk * per_elem
    tm_budget = (budget - N * tk * param_per_nk) // max(1, row_bytes)
    tm_raw = raw_target // max(1, N * tk * in_itemsize)
    tm = int(max(1, min(M, tm_budget, tm_raw)))

    # --- Guarantee >=2 grid steps along a parallel axis (v7x: 2 TensorCores).
    if pl.cdiv(M, tm) * pl.cdiv(K, tk) < 2:
        if M >= 2:
            tm = pl.cdiv(M, 2)
        elif K > 128 and tk == K:
            half = ((pl.cdiv(K, 2) + 127) // 128) * 128
            if 0 < half < K:
                tk = half
    return tm, tk, vmem_limit


def channelwise_layer_norm(y: jax.Array, gamma: jax.Array, beta: jax.Array) -> jax.Array:
    """cLN over [M, N, K]: normalize across the channel axis N."""
    M, N, K = y.shape
    assert gamma.shape == (1, N, 1) and beta.shape == (1, N, 1)

    in_itemsize = y.dtype.itemsize
    out_itemsize = y.dtype.itemsize
    TM, TK, vmem_limit = _select_tiles(M, N, K, in_itemsize, out_itemsize,
                                       _vmem_capacity_bytes())

    grid = (pl.cdiv(M, TM), pl.cdiv(K, TK))

    # Lane-dense, f32 scale/shift: resident block, read from HBM once.
    gamma_b = jnp.broadcast_to(gamma.astype(jnp.float32), (1, N, TK))
    beta_b = jnp.broadcast_to(beta.astype(jnp.float32), (1, N, TK))

    return pl.pallas_call(
        _cln_kernel,
        out_shape=jax.ShapeDtypeStruct((M, N, K), y.dtype),
        grid_spec=pltpu.PrefetchScalarGridSpec(
            num_scalar_prefetch=0,
            grid=grid,
            in_specs=[
                pl.BlockSpec((1, N, TK), lambda m, j: (0, 0, 0)),   # gamma (resident)
                pl.BlockSpec((1, N, TK), lambda m, j: (0, 0, 0)),   # beta  (resident)
                pl.BlockSpec((TM, N, TK), lambda m, j: (m, 0, j)),  # y tile
            ],
            out_specs=pl.BlockSpec((TM, N, TK), lambda m, j: (m, 0, j)),
        ),
        compiler_params=pltpu.CompilerParams(
            dimension_semantics=("parallel", "parallel"),
            vmem_limit_bytes=vmem_limit,
        ),
    )(gamma_b, beta_b, y)


def _reference(y, gamma, beta):
    y32 = y.astype(jnp.float32)
    mean = jnp.mean(y32, axis=1, keepdims=True)
    var = jnp.mean((y32 - mean) ** 2, axis=1, keepdims=True)  # unbiased=False
    return gamma.astype(jnp.float32) * (y32 - mean) / jnp.sqrt(var + EPS) + beta.astype(jnp.float32)


if __name__ == "__main__":
    key = jax.random.PRNGKey(0)

    tests = [
        ((2, 4, 16), jnp.float32, 1e-5),     # docstring-scale [M, N, K]
        ((3, 6, 256), jnp.float32, 1e-5),    # lane-aligned K, ragged M blocks
        ((1, 4, 384), jnp.float32, 1e-5),    # forces the >=2-step K split (masked K tail)
        ((5, 7, 192), jnp.float32, 1e-5),    # odd M/N, full-K contiguous blocks
        ((2, 6, 256), jnp.bfloat16, 5e-2),   # low-precision input, f32 accumulation
    ]

    for (M, N, K), dtype, tol in tests:
        k1, k2, k3, key = jax.random.split(key, 4)
        y = jax.random.normal(k1, (M, N, K), dtype=jnp.float32).astype(dtype)
        gamma = (1.0 + 0.1 * jax.random.normal(k2, (1, N, 1), dtype=jnp.float32)).astype(dtype)
        beta = (0.1 * jax.random.normal(k3, (1, N, 1), dtype=jnp.float32)).astype(dtype)

        out = channelwise_layer_norm(y, gamma, beta)
        out = jax.block_until_ready(out)

        ref = _reference(y, gamma, beta)
        assert out.shape == (M, N, K), out.shape
        assert out.dtype == dtype, out.dtype
        assert jnp.allclose(out.astype(jnp.float32), ref, atol=tol, rtol=tol), (
            f"mismatch vs reference for shape {(M, N, K)} dtype {dtype}"
        )

    print("KERNEL_OK")
</pallas_src>

<mosaic_0001>
module attributes {stable_mosaic.version = 11 : i64} {
  func.func @_cln_kernel(%arg0: i32, %arg1: i32, %arg2: memref<1x4x16xf32, #tpu.memory_space<vmem>>, %arg3: memref<1x4x16xf32, #tpu.memory_space<vmem>>, %arg4: memref<1x4x16xf32, #tpu.memory_space<vmem>>, %arg5: memref<1x4x16xf32, #tpu.memory_space<vmem>>) attributes {dimension_semantics = [#tpu.dimension_semantics<parallel>, #tpu.dimension_semantics<parallel>], iteration_bounds = array<i64: 2, 1>, scalar_prefetch = 0 : i64, scratch_operands = 0 : i64, tpu.core_type = #tpu.core_type<tc>, window_params = [{pipeline_mode = #tpu.pipeline_mode<synchronous>, transform_indices = @transform_0, window_bounds = array<i64: 1, 4, 16>}, {pipeline_mode = #tpu.pipeline_mode<synchronous>, transform_indices = @transform_1, window_bounds = array<i64: 1, 4, 16>}, {transform_indices = @transform_2, window_bounds = array<i64: 1, 4, 16>}, {transform_indices = @transform_3, window_bounds = array<i64: 1, 4, 16>}]} {
    %c0 = arith.constant 0 : index
    %c0_0 = arith.constant 0 : index
    %c0_1 = arith.constant 0 : index
    %0 = vector.load %arg4[%c0, %c0_0, %c0_1] : memref<1x4x16xf32, #tpu.memory_space<vmem>>, vector<1x4x16xf32>
    %cst = arith.constant dense<0.000000e+00> : vector<1x16xf32>
    %1 = vector.multi_reduction <add>, %0, %cst [1] : vector<1x4x16xf32> to vector<1x16xf32>
    %2 = vector.shape_cast %1 : vector<1x16xf32> to vector<1x1x16xf32>
    %cst_2 = arith.constant 4.000000e+00 : f32
    %3 = vector.broadcast %cst_2 : f32 to vector<1x1x16xf32>
    %4 = arith.divf %2, %3 : vector<1x1x16xf32>
    %5 = vector.broadcast %4 : vector<1x1x16xf32> to vector<1x4x16xf32>
    %6 = arith.subf %0, %5 : vector<1x4x16xf32>
    %7 = arith.mulf %6, %6 : vector<1x4x16xf32>
    %cst_3 = arith.constant dense<0.000000e+00> : vector<1x16xf32>
    %8 = vector.multi_reduction <add>, %7, %cst_3 [1] : vector<1x4x16xf32> to vector<1x16xf32>
    %9 = vector.shape_cast %8 : vector<1x16xf32> to vector<1x1x16xf32>
    %cst_4 = arith.constant 4.000000e+00 : f32
    %10 = vector.broadcast %cst_4 : f32 to vector<1x1x16xf32>
    %11 = arith.divf %9, %10 : vector<1x1x16xf32>
    %cst_5 = arith.constant 9.99999993E-9 : f32
    %12 = vector.broadcast %cst_5 : f32 to vector<1x1x16xf32>
    %13 = arith.addf %11, %12 : vector<1x1x16xf32>
    %14 = math.rsqrt %13 : vector<1x1x16xf32>
    %c0_6 = arith.constant 0 : index
    %c0_7 = arith.constant 0 : index
    %c0_8 = arith.constant 0 : index
    %15 = vector.load %arg2[%c0_6, %c0_7, %c0_8] : memref<1x4x16xf32, #tpu.memory_space<vmem>>, vector<1x4x16xf32>
    %16 = arith.mulf %15, %6 : vector<1x4x16xf32>
    %17 = vector.broadcast %14 : vector<1x1x16xf32> to vector<1x4x16xf32>
    %18 = arith.mulf %16, %17 : vector<1x4x16xf32>
    %c0_9 = arith.constant 0 : index
    %c0_10 = arith.constant 0 : index
    %c0_11 = arith.constant 0 : index
    %19 = vector.load %arg3[%c0_9, %c0_10, %c0_11] : memref<1x4x16xf32, #tpu.memory_space<vmem>>, vector<1x4x16xf32>
    %20 = arith.addf %18, %19 : vector<1x4x16xf32>
    %c0_12 = arith.constant 0 : index
    %c0_13 = arith.constant 0 : index
    %c0_14 = arith.constant 0 : index
    %21 = vector.load %arg5[%c0_12, %c0_13, %c0_14] : memref<1x4x16xf32, #tpu.memory_space<vmem>>, vector<1x4x16xf32>
    tpu.vector_store %arg5[%c0_12, %c0_13, %c0_14], %20 {strides = array<i32>} : memref<1x4x16xf32, #tpu.memory_space<vmem>>, vector<1x4x16xf32>,
    return
  }
  func.func @transform_0(%arg0: i32, %arg1: i32) -> (i32, i32, i32) {
    %c0_i32 = arith.constant 0 : i32
    %c0_i32_0 = arith.constant 0 : i32
    %c0_i32_1 = arith.constant 0 : i32
    %c0_i32_2 = arith.constant 0 : i32
    return %c0_i32, %c0_i32_0, %c0_i32_1 : i32, i32, i32
  }
  func.func @transform_1(%arg0: i32, %arg1: i32) -> (i32, i32, i32) {
    %c0_i32 = arith.constant 0 : i32
    %c0_i32_0 = arith.constant 0 : i32
    %c0_i32_1 = arith.constant 0 : i32
    %c0_i32_2 = arith.constant 0 : i32
    return %c0_i32, %c0_i32_0, %c0_i32_1 : i32, i32, i32
  }
  func.func @transform_2(%arg0: i32, %arg1: i32) -> (i32, i32, i32) {
    %c0_i32 = arith.constant 0 : i32
    %c0_i32_0 = arith.constant 0 : i32
    return %arg0, %c0_i32, %arg1 : i32, i32, i32
  }
  func.func @transform_3(%arg0: i32, %arg1: i32) -> (i32, i32, i32) {
    %c0_i32 = arith.constant 0 : i32
    %c0_i32_0 = arith.constant 0 : i32
    return %arg0, %c0_i32, %arg1 : i32, i32, i32
  }
}

</mosaic_0001>

<bundles_post_ra>
// kernel: tpu_custom_call.1
= control target key start
LH: loop header
LB: loop body
LE: loop exit
PB: predicated region body
PF: predicated region fallthrough
CT: control target
= control target key end

     0   :  { %8 = vsyncpa [#allocation3], 0  ;;  %s864_s0 = inlined_call_operand.hbm [shape: f32[1,4,16], index: 0, kind: input, shape index: {}]   ;;  %s865_s1 = inlined_call_operand.hbm [shape: f32[1,4,16], index: 1, kind: input, shape index: {}]   ;;  %s866_s2 = inlined_call_operand.hbm [shape: f32[2,4,16], index: 2, kind: input, shape index: {}]   ;;  %s867_s3 = inlined_call_operand.hbm [shape: f32[2,4,16], index: 3, kind: output, shape index: {}]  }
   0x1   :  { %9 = vsyncpa [#allocation6], 0 }
   0x2   :  { %10 = vsyncpa [#allocation4], 0 }
   0x3   :  { %12 = vsyncpa [#allocation4 + $0x1], 0  ;;  %s702_s12 = smov 0   ;;  %s704_s13 = smov 0  }
   0x4   :  { %s706_s14 = smov 0   ;;  %s708_s15 = smov 0  }
   0x5   :  { %s710_s16 = smov 0   ;;  %s712_s17 = smov 0  }
   0x6 LB: > { %s733_s18 = sadd.s32 4294967295, %s677_s17   ;;  %s393_s19 = sadd.s32 4294967294, %s677_s17   ;;  %s677_s17 = sphi %s712_s17, %s18_s17   ;;  %s673_s16 = sphi %s710_s16, %s877_s16   ;;  %s669_s15 = sphi %s708_s15, %s876_s15   ;;  %s665_s14 = sphi %s706_s14, %s875_s14   ;;  %s661_s13 = sphi %s704_s13, %s874_s13   ;;  %s657_s12 = sphi %s702_s12, %s873_s12  }
   0x7   : > { %p94_p0 = scmp.ne.s32.totalorder %s661_s13, %s657_s12  ;;  %p95_p1 = scmp.eq.s32.totalorder %s733_s18, 0 }
   0x8   : > { %p120_p2 = scmp.eq.s32.totalorder %s733_s18, 1  ;;  %p126_p3 = scmp.eq.s32.totalorder %s393_s19, 1 }
   0x9   : > { %p742_p4 = por %p95_p1, %p94_p0  ;;  %p394_p5 = scmp.ge.s32.totalorder %s677_s17, 1 }
   0xa   : > { %p747_p6 = por %p126_p3, %p94_p0  ;;  %p133_p7 = scmp.lt.s32.totalorder %s677_s17, 3 }
   0xb   : > { %s145_s24 = sshll.u32 %s864_s0, 4  ;;  %p397_p9 = scmp.ge.s32.totalorder %s677_s17, 2  ;;  %s146_s24 = int_to_ptr.hbm [resolvable:$true] %s145_s24 }
   0xc   : > { %p755_p8 = pnand %p394_p5, %p133_p7  ;;  %s679_s26 = smov [#allocation2]  }
   0xd   : > { %s147_s27 = sshll.u32 %s679_s26, 4  ;;  %s157_s30 = sshll.u32 %s865_s1, 4  ;;  %s148_s27 = int_to_ptr.vmem [resolvable:$true] %s147_s27  ;;  %s158_s30 = int_to_ptr.hbm [resolvable:$true] %s157_s30 }
   0xe   : > { %p421_p10 = pneg %p755_p8  ;;  %s680_s4 = smov [#allocation5]  }
   0xf   : > { %s159_s5 = sshll.u32 %s680_s4, 4  ;;  %s30_s6 = sadd.s32 1, %s673_s16  ;;  %s160_s5 = int_to_ptr.vmem [resolvable:$true] %s159_s5 }
  0x10   : > { %p422_p11 = pnand %p421_p10, %p95_p1  ;;  %s81_s7 = sadd.s32 1, %s665_s14 }
  0x11   : > { %p32_p12 = scmp.ge.s32.totalorder %s30_s6, 2  ;;  %p88_p13 = scmp.ne.s32.totalorder %s665_s14, %s661_s13 }
  0x12   : > { %424 = dma.hbm_to_vmem [thread:$0]  (!%p422_p11), %s146_s24, 64, %s148_s27, [#allocation3]  }
  0x13   : > { %427 = dma.hbm_to_vmem [thread:$0]  (!%p422_p11), %s158_s30, 64, %s160_s5, [#allocation6]  }
  0x14   : > { %p89_p0 = scmp.eq.s32.totalorder %s677_s17, 0  ;;  %p438_p3 = scmp.lt.s32.totalorder %s677_s17, 2 }
  0x15   : > { %s879_s6 = smov (%p32_p12, %s30_s6), 0  ;;  %p781_p7 = por %p120_p2, %p88_p13 }
  0x16   : > { %p775_p5 = por %p89_p0, %p88_p13  ;;  %s76_s10 = ssub.s32 %s673_s16, %s879_s6 }
  0x17   : > { %s170_s11 = sand.u32 1, %s677_s17   ;;  %p79_p10 = scmp.eq.s32.totalorder %s76_s10, 0 }
  0x18   : > { %s172_s19 = sand.u32 1, %s665_s14   ;;  %s399_s22 = sshll.u32 %s673_s16, 2 }
  0x19   : > { %s791_s23 = scalar_select %p79_p10, %s665_s14, %s81_s7  }
  0x1a   : > { %s398_s24 = sshll.u32 %s172_s19, 2  ;;  %s179_s28 = scalar_lea.hbm %s866_s2, %s399_s22 }
  0x1b   : > { %s181_s29 = sshll.u32 %s179_s28, 4  ;;  %s174_s30 = scalar_lea.vmem [#allocation7], %s398_s24  ;;  %s182_s29 = int_to_ptr.hbm [resolvable:$true] %s181_s29 }
  0x1c   : > { %s183_s4 = sshll.u32 %s174_s30, 4  ;;  %p429_p2 = pnand %p438_p3, %p775_p5  ;;  %s184_s4 = int_to_ptr.vmem [resolvable:$true] %s183_s4 }
  0x1d   : > { %s171_s5 = scalar_lea.sflag [#allocation3], %s170_s11  ;;  %192 = sbr.rel (%p755_p8) target bundleno = 106 (0x6a), region = 32 }
  0x1e   : > { %431 = dma.hbm_to_vmem [thread:$0]  (!%p429_p2), %s182_s29, 64, %s184_s4, %s171_s5  }
  0x22   : > { %640 = dma.done.wait (%p95_p1), [#allocation3], 64  }
  0x23   : > { %642 = vsyncadd (%p95_p1), [#allocation3], 4294967232 }
  0x24   : > { %644 = dma.done.wait (%p95_p1), [#allocation6], 64  }
  0x25   : > { %646 = vsyncadd (%p95_p1), [#allocation6], 4294967232  ;;  %s204_s7 = sand.u32 1, %s733_s18   ;;  %s206_s8 = sand.u32 1, %s661_s13  }
  0x26   : > { %s814_s25 = sshll.u32 %s206_s8, 2  ;;  %s205_s10 = scalar_lea.sflag [#allocation3], %s204_s7 }
  0x27   : > { %s208_s11 = scalar_lea.vmem [#allocation7], %s814_s25 }
  0x28   : > { %648 = dma.done.wait (%p742_p4), %s205_s10, 64  }
  0x29   : > { %650 = vsyncadd (%p742_p4), %s205_s10, 4294967232  ;;  %v681_v0 = vmov 4.0   ;;  %vm233_vm0 = vcmask 125952   ;;  %v232_v2 = vld [vmem:[%s208_s11] sm:$0xf]  ;;  %s406_s18 = sshll.u32 %s669_s15, 2 }
  0x2a   : > { %493 = vrcp.f32 %v681_v0  ;;  %v234_v3 = vsel %vm233_vm0, %v232_v2, 0.0  ;;  %v270_v31 = vld [vmem:[#allocation2] sm:$0xf]  ;;  %s288_s22 = scalar_lea.hbm %s867_s3, %s406_s18  ;;  %v273_v36 = vld [vmem:[#allocation5] sm:$0xf]  ;;  %s231_s24 = scalar_lea.vmem [#allocation8], %s814_s25 }
  0x2b   : > { %v235_v5 = vrot.slane %v234_v3, 4  ;;  %s290_s26 = sshll.u32 %s231_s24, 4  ;;  %s292_s27 = sshll.u32 %s288_s22, 4  ;;  %s291_s26 = int_to_ptr.vmem [resolvable:$true] %s290_s26  ;;  %s293_s27 = int_to_ptr.hbm [resolvable:$true] %s292_s27 }
  0x2c   : > { %s277_s15 = scalar_lea.sflag [#allocation4], %s206_s8  ;;  %s601_s28 = sshra.s32 %s293_s27, 4  ;;  %s602_s28 = int_to_ptr.hbm [resolvable:$true] %s601_s28 }
  0x2d   : > { %v236_v7 = vadd.f32 %v235_v5, %v234_v3  ;;  %s603_s29 = scalar_lea.hbm %s602_s28, 4  ;;  %s607_s5 = scalar_lea.hbm %s867_s3, 8 }
  0x2e   : > { %p604_p1 = scmp.ne.s32.totalorder %s602_s28, %s603_s29  ;;  %p608_p11 = scmp.lt.s32.totalorder %s602_s28, %s867_s3 }
  0x2f   : > { %v237_v9 = vrot.slane %v236_v7, 2  ;;  %p609_p12 = scmp.lt.s32.totalorder %s607_s5, %s603_s29 }
  0x30   : > { %v494_v1 = vpop.eup %493  ;;  %p605_p4 = pnand %p604_p1, %p781_p7 }
  0x31   : > { %v242_v4 = vmul.f32 4.0, %v494_v1  ;;  %v238_v11 = vadd.f32 %v237_v9, %v236_v7  ;;  %vm246_vm1 = vweird.f32 %v494_v1  ;;  %p610_p13 = por %p609_p12, %p608_p11 }
  0x32   : > { %p606_p8 = pneg %p605_p4 }
  0x33   : > { %v243_v6 = vsub.f32 1.0, %v242_v4  ;;  %v239_v12 = vrot.slane %v238_v11, 1 }
  0x34   : > { %p611_p0 = pnand %p610_p13, %p606_p8 }
  0x35   : > { %v244_v8 = vmul.f32 %v494_v1, %v243_v6  ;;  %v240_v14 = vadd.f32 %v239_v12, %v238_v11 }
  0x37   : > { %v245_v10 = vadd.f32 %v494_v1, %v244_v8 }
  0x39   : > { %v247_v13 = vsel %vm246_vm1, %v494_v1, %v245_v10 }
  0x3a   : > { %v248_v15 = vmul.f32 %v247_v13, %v240_v14 }
  0x3c   : > { %v249_v16 = vsub.f32 %v232_v2, %v248_v15 }
  0x3e   : > { %v250_v17 = vmul.f32 %v249_v16, %v249_v16  ;;  %v271_v33 = vmul.f32 %v270_v31, %v249_v16 }
  0x40   : > { %v251_v18 = vsel %vm233_vm0, %v250_v17, 0.0 }
  0x41   : > { %v252_v19 = vrot.slane %v251_v18, 4 }
  0x43   : > { %v253_v20 = vadd.f32 %v252_v19, %v251_v18 }
  0x45   : > { %v254_v21 = vrot.slane %v253_v20, 2 }
  0x47   : > { %v255_v22 = vadd.f32 %v254_v21, %v253_v20 }
  0x49   : > { %v256_v23 = vrot.slane %v255_v22, 1 }
  0x4b   : > { %v257_v24 = vadd.f32 %v256_v23, %v255_v22 }
  0x4d   : > { %v258_v25 = vmul.f32 %v257_v24, %v247_v13 }
  0x4f   : > { %v259_v26 = vadd.f32 1e-08, %v258_v25 }
  0x51   : > { %495 = vrsqrt.f32 %v259_v26  ;;  %vm266_vm2 = vweird.f32 %v259_v26 }
  0x57   : > { %v496_v27 = vpop.eup %495 }
  0x58   : > { %v261_v28 = vmul.f32 %v496_v27, %v259_v26  ;;  %vm267_vm3 = vweird.f32 %v496_v27 }
  0x59   : > { %vm268_vm4 = vmor %vm266_vm2, %vm267_vm3 }
  0x5a   : > { %v262_v29 = vmul.f32 %v496_v27, %v261_v28 }
  0x5c   : > { %v263_v30 = vmul.f32 0.5, %v262_v29 }
  0x5e   : > { %v264_v32 = vsub.f32 1.5, %v263_v30 }
  0x60   : > { %v265_v34 = vmul.f32 %v496_v27, %v264_v32 }
  0x62   : > { %v269_v35 = vsel %vm268_vm4, %v496_v27, %v265_v34 }
  0x63   : > { %v272_v37 = vmul.f32 %v271_v33, %v269_v35 }
  0x65   : > { %v274_v38 = vadd.f32 %v273_v36, %v272_v37 }
  0x67   : > { %275 = vst.msk [vmem:[%s231_s24] sm:$0xf] %vm233_vm0, %v274_v38 }
  0x68   : > { %614 = shalt.err (!%p611_p0)
}
  0x69   : > { %419 = dma.vmem_to_hbm [thread:$0]  (%p781_p7), %s291_s26, 64, %s293_s27, %s277_s15  }
  0x6a PF: > { %s304_s8 = sand.u32 1, %s657_s12   ;;  %p433_p3 = pnand %p397_p9, %p747_p6 }
  0x6b   : > { %s305_s10 = scalar_lea.sflag [#allocation4], %s304_s8 }
  0x6c   : > { %p434_p5 = pneg %p433_p3 }
  0x6e   : > { %652 = dma.done.wait (%p434_p5), %s305_s10, 64  }
  0x6f   : > { %654 = vsyncadd (%p434_p5), %s305_s10, 4294967232  ;;  %s18_s17 = sadd.s32 1, %s677_s17   ;;  %s873_s12 = smov %s661_s13 }
  0x70   : > { %p15_p10 = scmp.ge.s32.totalorder %s18_s17, 4   ;;  %s874_s13 = smov %s665_s14 }
  0x71   : > { %s875_s14 = smov %s791_s23  ;;  %s876_s15 = smov %s673_s16 }
  0x72   : > { %s877_s16 = smov %s879_s6  ;;  %17 = sbr.rel (!%p15_p10) target bundleno = 6 (0x6), region = 84 }
  0x77   :  { %311 = vsyncpa [#allocation3], 1 }
  0x78   :  { %313 = vsyncpa [#allocation3 + $0x1], 1 }
  0x79   :  { %314 = vsyncpa [#allocation6], 1 }
  0x7a   :  { %315 = vsyncpa [#allocation4], 1 }
  0x7b   :  { %317 = vsyncpa [#allocation4 + $0x1], 1 }

</bundles_post_ra>
